<compile_context>
chip_gen: v6e
topology: v6e:2x2x1
jax: 0.10.0
libtpu: 0.0.40
codegen_flags: <defaults>
</compile_context>

<pallas_src>
import numpy as np
import jax
import jax.numpy as jnp
from jax.experimental import pallas as pl
from jax.experimental.pallas import tpu as pltpu

try:  # optional; pure-numpy fallback below if scipy is unavailable
    from scipy.optimize import linear_sum_assignment as _scipy_lsa
except Exception:  # pragma: no cover
    _scipy_lsa = None


def _round_up(x: int, m: int) -> int:
    return ((x + m - 1) // m) * m


# ----------------------------------------------------------------------------
# Pallas kernel: per-image cost block
#   C = w_bbox * L1(out_bbox, tgt_bbox)
#     + softmax(logits) @ (-cost_class * one_hot(labels))^T      (class term)
#     + w_giou * (-GIoU(xyxy(out_bbox), xyxy(tgt_bbox)))
# Block shapes seen by the kernel (leading image dim of size 1):
#   logits_ref (1, TQ, Cp), qbox_ref (1, TQ, 4),
#   negoh_ref (1, Cp, Kp), tbox_ref (1, 4, Kp), c_ref (1, TQ, Kp)
# w_bbox is the residual L1 weight still applied in-kernel (1.0 when the
# weight was folded into the box coordinates on the host).
# ----------------------------------------------------------------------------
def _make_cost_kernel(w_bbox: float, w_giou: float):
    def kernel(logits_ref, qbox_ref, negoh_ref, tbox_ref, c_ref):
        # ---- class cost: softmax over padded classes, gather+weight+negate is
        # folded into the pre-scaled one-hot matrix -> single MXU matmul.
        logits = logits_ref[0]                                        # (TQ, Cp)
        m = jnp.max(logits, axis=-1, keepdims=True)
        e = jnp.exp(logits - m)
        prob = e * pl.reciprocal(jnp.sum(e, axis=-1, keepdims=True), approx=True)
        cost = jnp.dot(prob, negoh_ref[0],
                       preferred_element_type=jnp.float32)            # (TQ, Kp)

        # ---- box tensors (cxcywh); all broadcasts are (TQ,1) op (1,Kp)
        qb = qbox_ref[0]                                              # (TQ, 4)
        tb = tbox_ref[0]                                              # (4, Kp)
        qcx, qcy, qw, qh = qb[:, 0:1], qb[:, 1:2], qb[:, 2:3], qb[:, 3:4]
        tcx, tcy, tw, th = tb[0:1, :], tb[1:2, :], tb[2:3, :], tb[3:4, :]

        # ---- L1 (cdist p=1) on cxcywh (already weight-scaled when folded)
        if w_bbox != 0.0:
            l1 = (jnp.abs(qcx - tcx) + jnp.abs(qcy - tcy)
                  + jnp.abs(qw - tw) + jnp.abs(qh - th))              # (TQ, Kp)
            cost = cost + (l1 if w_bbox == 1.0 else w_bbox * l1)

        # ---- GIoU on xyxy (scale-invariant, so the cost_bbox fold is harmless)
        if w_giou != 0.0:
            qx1, qy1 = qcx - 0.5 * qw, qcy - 0.5 * qh
            qx2, qy2 = qcx + 0.5 * qw, qcy + 0.5 * qh
            tx1, ty1 = tcx - 0.5 * tw, tcy - 0.5 * th
            tx2, ty2 = tcx + 0.5 * tw, tcy + 0.5 * th

            area_q = (qx2 - qx1) * (qy2 - qy1)                        # (TQ,1)
            area_t = (tx2 - tx1) * (ty2 - ty1)                        # (1,Kp)

            iw = jnp.maximum(jnp.minimum(qx2, tx2) - jnp.maximum(qx1, tx1), 0.0)
            ih = jnp.maximum(jnp.minimum(qy2, ty2) - jnp.maximum(qy1, ty1), 0.0)
            inter = iw * ih                                           # (TQ,Kp)
            union = jnp.maximum(area_q + area_t - inter, 1e-9)
            enc = jnp.maximum(
                (jnp.maximum(qx2, tx2) - jnp.minimum(qx1, tx1))
                * (jnp.maximum(qy2, ty2) - jnp.minimum(qy1, ty1)), 1e-9)
            iou = inter * pl.reciprocal(union, approx=True)
            # cost_giou = -giou = 1 - iou - union / enc
            neg_giou = 1.0 - iou - union * pl.reciprocal(enc, approx=True)
            cost = cost + (neg_giou if w_giou == 1.0 else w_giou * neg_giou)

        c_ref[0] = cost.astype(c_ref.dtype)

    return kernel


def compute_cost_blocks(logits, boxes, neg_onehot_t, tbox_t, *,
                        w_bbox, w_giou, tq):
    """logits (bs, NQp, Cp), boxes (bs, NQp, 4), neg_onehot_t (bs, Cp, Kp),
    tbox_t (bs, 4, Kp)  ->  (bs, NQp, Kp) f32 per-image cost blocks."""
    bs, nqp, cp = logits.shape
    kp = tbox_t.shape[-1]
    assert nqp % tq == 0 and tq % 8 == 0 and kp % 128 == 0 and cp % 128 == 0
    kernel = _make_cost_kernel(w_bbox, w_giou)
    return pl.pallas_call(
        kernel,
        out_shape=jax.ShapeDtypeStruct((bs, nqp, kp), jnp.float32),
        grid=(bs, nqp // tq),
        in_specs=[
            pl.BlockSpec((1, tq, cp), lambda b, q: (b, q, 0)),
            pl.BlockSpec((1, tq, 4), lambda b, q: (b, q, 0)),
            pl.BlockSpec((1, cp, kp), lambda b, q: (b, 0, 0)),
            pl.BlockSpec((1, 4, kp), lambda b, q: (b, 0, 0)),
        ],
        out_specs=pl.BlockSpec((1, tq, kp), lambda b, q: (b, q, 0)),
        compiler_params=pltpu.CompilerParams(
            dimension_semantics=("parallel", "parallel")),
    )(logits, boxes, neg_onehot_t, tbox_t)


# ----------------------------------------------------------------------------
# Host-side linear-sum-assignment (scipy if present, else pure-numpy JV-style).
# TODO(synk): the Hungarian algorithm is inherently sequential; it stays host-side.
# ----------------------------------------------------------------------------
def _hungarian(cost):
    cost = np.asarray(cost, dtype=np.float64)
    if cost.size == 0 or min(cost.shape) == 0:
        return np.empty(0, np.int64), np.empty(0, np.int64)
    transposed = cost.shape[0] > cost.shape[1]
    if transposed:
        cost = cost.T
    n, m = cost.shape                                   # n <= m
    u = np.zeros(n + 1)
    v = np.zeros(m + 1)
    p = np.zeros(m + 1, dtype=np.int64)                 # row matched to column j
    way = np.zeros(m + 1, dtype=np.int64)
    for i in range(1, n + 1):
        p[0] = i
        j0 = 0
        minv = np.full(m + 1, np.inf)
        used = np.zeros(m + 1, dtype=bool)
        while True:
            used[j0] = True
            i0 = p[j0]
            cur = cost[i0 - 1] - u[i0] - v[1:]          # (m,)
            free = ~used[1:]
            upd = free & (cur < minv[1:])
            if np.any(upd):
                mview, wview = minv[1:], way[1:]
                mview[upd] = cur[upd]
                wview[upd] = j0
            cand = np.where(free, minv[1:], np.inf)
            j1 = int(np.argmin(cand)) + 1
            delta = cand[j1 - 1]
            u[p[used]] += delta
            v[used] -= delta
            mview = minv[1:]
            mview[free] -= delta
            j0 = j1
            if p[j0] == 0:
                break
        while j0 != 0:
            j1 = way[j0]
            p[j0] = p[j1]
            j0 = j1
    rows = p[1:]
    cols = np.nonzero(rows > 0)[0]
    rr = rows[cols] - 1
    if transposed:
        r_idx, c_idx = cols.astype(np.int64), rr.astype(np.int64)
    else:
        r_idx, c_idx = rr.astype(np.int64), cols.astype(np.int64)
    order = np.argsort(r_idx, kind="stable")
    return r_idx[order], c_idx[order]


def _linear_sum_assignment(cost):
    if _scipy_lsa is not None:
        r, c = _scipy_lsa(np.asarray(cost, dtype=np.float64))
        return np.asarray(r, np.int64), np.asarray(c, np.int64)
    return _hungarian(cost)


# ----------------------------------------------------------------------------
# HungarianMatcher forward (Pallas-backed cost blocks + host assignment)
# ----------------------------------------------------------------------------
class HungarianMatcherPallas:
    def __init__(self, cost_class: float = 1.0, cost_bbox: float = 1.0,
                 cost_giou: float = 1.0):
        assert cost_class != 0 or cost_bbox != 0 or cost_giou != 0, "all costs cant be 0"
        self.cost_class = float(cost_class)
        self.cost_bbox = float(cost_bbox)
        self.cost_giou = float(cost_giou)

    def __call__(self, outputs, targets):
        pred_logits = outputs["pred_logits"]          # (bs, nq, num_classes)
        pred_boxes = outputs["pred_boxes"]            # (bs, nq, 4)  cxcywh
        bs, nq, num_classes = pred_logits.shape
        assert len(targets) == bs

        sizes = [int(t["boxes"].shape[0]) for t in targets]
        max_k = max(sizes) if sizes else 0

        # ---- pad class and target axes to multiples of 128 (lane-dense vregs,
        # aligned MXU K dim, unmasked vector stores)
        cp = _round_up(num_classes, 128)
        kp = _round_up(max(max_k, 1), 128)

        # ---- tile the query axis: multiple of 8, capped so (TQ,Kp)
        # intermediates stay in registers / small VMEM (stays within v7x's
        # 32 MiB default scoped VMEM even without an explicit limit)
        tq_cap = 256 if kp <= 256 else 128
        tq = min(_round_up(nq, 8), tq_cap)
        nq_pad = _round_up(nq, tq)
        # v7x: guarantee >= 2 grid programs so both TensorCores get work
        while bs * (nq_pad // tq) < 2 and tq > 8:
            tq = max(8, _round_up(tq // 2, 8))
            nq_pad = _round_up(nq, tq)

        # ---- logits: pad queries with 0, classes with -1e9 (softmax-neutral)
        logits = pred_logits.astype(jnp.float32)
        logits = jnp.pad(logits, ((0, 0), (0, nq_pad - nq), (0, 0)))
        logits = jnp.pad(logits, ((0, 0), (0, 0), (0, cp - num_classes)),
                         constant_values=-1e9)

        # ---- padded query rows get a harmless valid box; sliced off on host
        boxes = jnp.pad(pred_boxes.astype(jnp.float32),
                        ((0, 0), (0, nq_pad - nq), (0, 0)),
                        constant_values=0.25)

        # per-image padded targets: label -1 -> all-zero one-hot column;
        # dummy box (0.5, 0.5, 1, 1) keeps union / enclosing area strictly > 0.
        labels_pad = np.full((bs, kp), -1, dtype=np.int32)
        boxes_pad = np.tile(np.asarray([0.5, 0.5, 1.0, 1.0], np.float32),
                            (bs, kp, 1))
        for b, t in enumerate(targets):
            k = sizes[b]
            if k:
                labels_pad[b, :k] = np.asarray(t["labels"], dtype=np.int32)
                boxes_pad[b, :k, :] = np.asarray(t["boxes"], dtype=np.float32)

        # ---- fold weights/signs into the inputs
        #   class:  one_hot * (-cost_class)  -> MXU output is the final class term
        #   bbox :  scale both box sets by cost_bbox (GIoU is scale-invariant,
        #           so only the L1 term picks up the weight); only when > 0 so
        #           boxes can't become degenerate.
        fold_bbox = self.cost_bbox > 0.0
        box_scale = self.cost_bbox if fold_bbox else 1.0
        w_bbox_kernel = 1.0 if fold_bbox else self.cost_bbox

        neg_onehot_t = jnp.transpose(
            jax.nn.one_hot(jnp.asarray(labels_pad), cp, dtype=jnp.float32),
            (0, 2, 1)) * (-self.cost_class)                           # (bs, Cp, Kp)
        tbox_t = jnp.transpose(jnp.asarray(boxes_pad) * box_scale,
                               (0, 2, 1))                             # (bs, 4, Kp)
        if box_scale != 1.0:
            boxes = boxes * box_scale

        C = compute_cost_blocks(logits, boxes, neg_onehot_t, tbox_t,
                                w_bbox=w_bbox_kernel,
                                w_giou=self.cost_giou,
                                tq=tq)                                # (bs, NQp, Kp)

        # ---- slice off padding on device before the host copy
        C_used = C[:, :nq, :max(max_k, 1)]
        C_np = np.asarray(jax.device_get(jax.block_until_ready(C_used)))

        indices = []
        for b, k in enumerate(sizes):
            if k == 0:
                indices.append((jnp.zeros((0,), jnp.int32),
                                jnp.zeros((0,), jnp.int32)))
                continue
            i, j = _linear_sum_assignment(C_np[b, :, :k])
            indices.append((jnp.asarray(i, dtype=jnp.int32),
                            jnp.asarray(j, dtype=jnp.int32)))
        return indices


if __name__ == "__main__":
    key = jax.random.PRNGKey(0)
    bs, num_queries, num_classes = 2, 8, 8
    k_logits, k_boxes, k_tl0, k_tb0, k_tl1, k_tb1 = jax.random.split(key, 6)

    pred_logits = jax.random.normal(k_logits, (bs, num_queries, num_classes),
                                    dtype=jnp.float32)
    # predicted boxes in cxcywh, kept in a sane range
    pred_boxes = jnp.concatenate(
        [jax.random.uniform(k_boxes, (bs, num_queries, 2),
                            minval=0.2, maxval=0.8),
         jax.random.uniform(k_boxes, (bs, num_queries, 2),
                            minval=0.1, maxval=0.3)], axis=-1)

    # targets: image 0 has 3 boxes, image 1 has 2 boxes
    targets = [
        {"labels": jax.random.randint(k_tl0, (3,), 0, num_classes),
         "boxes": jnp.concatenate(
             [jax.random.uniform(k_tb0, (3, 2), minval=0.2, maxval=0.8),
              jax.random.uniform(k_tb0, (3, 2), minval=0.1, maxval=0.3)], axis=-1)},
        {"labels": jax.random.randint(k_tl1, (2,), 0, num_classes),
         "boxes": jnp.concatenate(
             [jax.random.uniform(k_tb1, (2, 2), minval=0.2, maxval=0.8),
              jax.random.uniform(k_tb1, (2, 2), minval=0.1, maxval=0.3)], axis=-1)},
    ]

    matcher = HungarianMatcherPallas(cost_class=1.0, cost_bbox=1.0, cost_giou=1.0)
    indices = matcher({"pred_logits": pred_logits, "pred_boxes": pred_boxes},
                      targets)
    for i, j in indices:
        jax.block_until_ready(i)
        jax.block_until_ready(j)
    print("KERNEL_OK")
</pallas_src>

<mosaic_0001>
module attributes {stable_mosaic.version = 11 : i64} {
  func.func @kernel(%arg0: i32, %arg1: i32, %arg2: memref<1x8x128xf32, #tpu.memory_space<vmem>>, %arg3: memref<1x8x4xf32, #tpu.memory_space<vmem>>, %arg4: memref<1x128x128xf32, #tpu.memory_space<vmem>>, %arg5: memref<1x4x128xf32, #tpu.memory_space<vmem>>, %arg6: memref<1x8x128xf32, #tpu.memory_space<vmem>>) attributes {dimension_semantics = [#tpu.dimension_semantics<parallel>, #tpu.dimension_semantics<parallel>], iteration_bounds = array<i64: 2, 1>, scalar_prefetch = 0 : i64, scratch_operands = 0 : i64, tpu.core_type = #tpu.core_type<tc>, window_params = [{transform_indices = @transform_0, window_bounds = array<i64: 1, 8, 128>}, {transform_indices = @transform_1, window_bounds = array<i64: 1, 8, 4>}, {transform_indices = @transform_2, window_bounds = array<i64: 1, 128, 128>}, {transform_indices = @transform_3, window_bounds = array<i64: 1, 4, 128>}, {transform_indices = @transform_4, window_bounds = array<i64: 1, 8, 128>}]} {
    %c0 = arith.constant 0 : index
    %c0_0 = arith.constant 0 : index
    %c0_1 = arith.constant 0 : index
    %0 = vector.load %arg2[%c0, %c0_0, %c0_1] : memref<1x8x128xf32, #tpu.memory_space<vmem>>, vector<1x8x128xf32>
    %1 = vector.shape_cast %0 : vector<1x8x128xf32> to vector<8x128xf32>
    %cst = arith.constant dense<0xFF800000> : vector<8xf32>
    %2 = vector.multi_reduction <maximumf>, %1, %cst [1] : vector<8x128xf32> to vector<8xf32>
    %3 = vector.shape_cast %2 : vector<8xf32> to vector<8x1xf32>
    %4 = vector.broadcast %3 : vector<8x1xf32> to vector<8x128xf32>
    %5 = arith.subf %1, %4 : vector<8x128xf32>
    %6 = math.exp %5 : vector<8x128xf32>
    %cst_2 = arith.constant dense<0.000000e+00> : vector<8xf32>
    %7 = vector.multi_reduction <add>, %6, %cst_2 [1] : vector<8x128xf32> to vector<8xf32>
    %8 = vector.shape_cast %7 : vector<8xf32> to vector<8x1xf32>
    %9 = tpu.reciprocal %8 {approx = true} : vector<8x1xf32> -> vector<8x1xf32>
    %10 = vector.broadcast %9 : vector<8x1xf32> to vector<8x128xf32>
    %11 = arith.mulf %6, %10 : vector<8x128xf32>
    %c0_3 = arith.constant 0 : index
    %c0_4 = arith.constant 0 : index
    %c0_5 = arith.constant 0 : index
    %12 = vector.load %arg4[%c0_3, %c0_4, %c0_5] : memref<1x128x128xf32, #tpu.memory_space<vmem>>, vector<1x128x128xf32>
    %13 = vector.shape_cast %12 : vector<1x128x128xf32> to vector<128x128xf32>
    %cst_6 = arith.constant dense<0.000000e+00> : vector<8x128xf32>
    %14 = tpu.matmul %11, %13, %cst_6 {dimension_numbers = #tpu.dot_dimension_numbers<[1], [0], [0], [1], [0, 0, 1, 1], [], []>} : vector<8x128xf32>, vector<128x128xf32>, vector<8x128xf32> -> vector<8x128xf32>
    %c0_7 = arith.constant 0 : index
    %c0_8 = arith.constant 0 : index
    %c0_9 = arith.constant 0 : index
    %15 = vector.load %arg3[%c0_7, %c0_8, %c0_9] : memref<1x8x4xf32, #tpu.memory_space<vmem>>, vector<1x8x4xf32>
    %16 = vector.shape_cast %15 : vector<1x8x4xf32> to vector<8x4xf32>
    %c0_10 = arith.constant 0 : index
    %c0_11 = arith.constant 0 : index
    %c0_12 = arith.constant 0 : index
    %17 = vector.load %arg5[%c0_10, %c0_11, %c0_12] : memref<1x4x128xf32, #tpu.memory_space<vmem>>, vector<1x4x128xf32>
    %18 = vector.shape_cast %17 : vector<1x4x128xf32> to vector<4x128xf32>
    %19 = vector.extract_strided_slice %16 {offsets = [0, 0], sizes = [8, 1], strides = [1, 1]} : vector<8x4xf32> to vector<8x1xf32>
    %20 = vector.extract_strided_slice %16 {offsets = [0, 1], sizes = [8, 1], strides = [1, 1]} : vector<8x4xf32> to vector<8x1xf32>
    %21 = vector.extract_strided_slice %16 {offsets = [0, 2], sizes = [8, 1], strides = [1, 1]} : vector<8x4xf32> to vector<8x1xf32>
    %22 = vector.extract_strided_slice %16 {offsets = [0, 3], sizes = [8, 1], strides = [1, 1]} : vector<8x4xf32> to vector<8x1xf32>
    %23 = vector.extract_strided_slice %18 {offsets = [0, 0], sizes = [1, 128], strides = [1, 1]} : vector<4x128xf32> to vector<1x128xf32>
    %24 = vector.extract_strided_slice %18 {offsets = [1, 0], sizes = [1, 128], strides = [1, 1]} : vector<4x128xf32> to vector<1x128xf32>
    %25 = vector.extract_strided_slice %18 {offsets = [2, 0], sizes = [1, 128], strides = [1, 1]} : vector<4x128xf32> to vector<1x128xf32>
    %26 = vector.extract_strided_slice %18 {offsets = [3, 0], sizes = [1, 128], strides = [1, 1]} : vector<4x128xf32> to vector<1x128xf32>
    %27 = vector.broadcast %19 : vector<8x1xf32> to vector<8x128xf32>
    %28 = vector.broadcast %23 : vector<1x128xf32> to vector<8x128xf32>
    %29 = arith.subf %27, %28 : vector<8x128xf32>
    %30 = math.absf %29 : vector<8x128xf32>
    %31 = vector.broadcast %20 : vector<8x1xf32> to vector<8x128xf32>
    %32 = vector.broadcast %24 : vector<1x128xf32> to vector<8x128xf32>
    %33 = arith.subf %31, %32 : vector<8x128xf32>
    %34 = math.absf %33 : vector<8x128xf32>
    %35 = arith.addf %30, %34 : vector<8x128xf32>
    %36 = vector.broadcast %21 : vector<8x1xf32> to vector<8x128xf32>
    %37 = vector.broadcast %25 : vector<1x128xf32> to vector<8x128xf32>
    %38 = arith.subf %36, %37 : vector<8x128xf32>
    %39 = math.absf %38 : vector<8x128xf32>
    %40 = arith.addf %35, %39 : vector<8x128xf32>
    %41 = vector.broadcast %22 : vector<8x1xf32> to vector<8x128xf32>
    %42 = vector.broadcast %26 : vector<1x128xf32> to vector<8x128xf32>
    %43 = arith.subf %41, %42 : vector<8x128xf32>
    %44 = math.absf %43 : vector<8x128xf32>
    %45 = arith.addf %40, %44 : vector<8x128xf32>
    %46 = arith.addf %14, %45 : vector<8x128xf32>
    %cst_13 = arith.constant 5.000000e-01 : f32
    %47 = vector.broadcast %cst_13 : f32 to vector<8x1xf32>
    %48 = arith.mulf %47, %21 : vector<8x1xf32>
    %49 = arith.subf %19, %48 : vector<8x1xf32>
    %cst_14 = arith.constant 5.000000e-01 : f32
    %50 = vector.broadcast %cst_14 : f32 to vector<8x1xf32>
    %51 = arith.mulf %50, %22 : vector<8x1xf32>
    %52 = arith.subf %20, %51 : vector<8x1xf32>
    %cst_15 = arith.constant 5.000000e-01 : f32
    %53 = vector.broadcast %cst_15 : f32 to vector<8x1xf32>
    %54 = arith.mulf %53, %21 : vector<8x1xf32>
    %55 = arith.addf %19, %54 : vector<8x1xf32>
    %cst_16 = arith.constant 5.000000e-01 : f32
    %56 = vector.broadcast %cst_16 : f32 to vector<8x1xf32>
    %57 = arith.mulf %56, %22 : vector<8x1xf32>
    %58 = arith.addf %20, %57 : vector<8x1xf32>
    %cst_17 = arith.constant 5.000000e-01 : f32
    %59 = vector.broadcast %cst_17 : f32 to vector<1x128xf32>
    %60 = arith.mulf %59, %25 : vector<1x128xf32>
    %61 = arith.subf %23, %60 : vector<1x128xf32>
    %cst_18 = arith.constant 5.000000e-01 : f32
    %62 = vector.broadcast %cst_18 : f32 to vector<1x128xf32>
    %63 = arith.mulf %62, %26 : vector<1x128xf32>
    %64 = arith.subf %24, %63 : vector<1x128xf32>
    %cst_19 = arith.constant 5.000000e-01 : f32
    %65 = vector.broadcast %cst_19 : f32 to vector<1x128xf32>
    %66 = arith.mulf %65, %25 : vector<1x128xf32>
    %67 = arith.addf %23, %66 : vector<1x128xf32>
    %cst_20 = arith.constant 5.000000e-01 : f32
    %68 = vector.broadcast %cst_20 : f32 to vector<1x128xf32>
    %69 = arith.mulf %68, %26 : vector<1x128xf32>
    %70 = arith.addf %24, %69 : vector<1x128xf32>
    %71 = arith.subf %55, %49 : vector<8x1xf32>
    %72 = arith.subf %58, %52 : vector<8x1xf32>
    %73 = arith.mulf %71, %72 : vector<8x1xf32>
    %74 = arith.subf %67, %61 : vector<1x128xf32>
    %75 = arith.subf %70, %64 : vector<1x128xf32>
    %76 = arith.mulf %74, %75 : vector<1x128xf32>
    %77 = vector.broadcast %55 : vector<8x1xf32> to vector<8x128xf32>
    %78 = vector.broadcast %67 : vector<1x128xf32> to vector<8x128xf32>
    %79 = arith.minimumf %77, %78 : vector<8x128xf32>
    %80 = vector.broadcast %49 : vector<8x1xf32> to vector<8x128xf32>
    %81 = vector.broadcast %61 : vector<1x128xf32> to vector<8x128xf32>
    %82 = arith.maximumf %80, %81 : vector<8x128xf32>
    %83 = arith.subf %79, %82 : vector<8x128xf32>
    %cst_21 = arith.constant 0.000000e+00 : f32
    %84 = vector.broadcast %cst_21 : f32 to vector<8x128xf32>
    %85 = arith.maximumf %83, %84 : vector<8x128xf32>
    %86 = vector.broadcast %58 : vector<8x1xf32> to vector<8x128xf32>
    %87 = vector.broadcast %70 : vector<1x128xf32> to vector<8x128xf32>
    %88 = arith.minimumf %86, %87 : vector<8x128xf32>
    %89 = vector.broadcast %52 : vector<8x1xf32> to vector<8x128xf32>
    %90 = vector.broadcast %64 : vector<1x128xf32> to vector<8x128xf32>
    %91 = arith.maximumf %89, %90 : vector<8x128xf32>
    %92 = arith.subf %88, %91 : vector<8x128xf32>
    %cst_22 = arith.constant 0.000000e+00 : f32
    %93 = vector.broadcast %cst_22 : f32 to vector<8x128xf32>
    %94 = arith.maximumf %92, %93 : vector<8x128xf32>
    %95 = arith.mulf %85, %94 : vector<8x128xf32>
    %96 = vector.broadcast %73 : vector<8x1xf32> to vector<8x128xf32>
    %97 = vector.broadcast %76 : vector<1x128xf32> to vector<8x128xf32>
    %98 = arith.addf %96, %97 : vector<8x128xf32>
    %99 = arith.subf %98, %95 : vector<8x128xf32>
    %cst_23 = arith.constant 9.99999971E-10 : f32
    %100 = vector.broadcast %cst_23 : f32 to vector<8x128xf32>
    %101 = arith.maximumf %99, %100 : vector<8x128xf32>
    %102 = vector.broadcast %55 : vector<8x1xf32> to vector<8x128xf32>
    %103 = vector.broadcast %67 : vector<1x128xf32> to vector<8x128xf32>
    %104 = arith.maximumf %102, %103 : vector<8x128xf32>
    %105 = vector.broadcast %49 : vector<8x1xf32> to vector<8x128xf32>
    %106 = vector.broadcast %61 : vector<1x128xf32> to vector<8x128xf32>
    %107 = arith.minimumf %105, %106 : vector<8x128xf32>
    %108 = arith.subf %104, %107 : vector<8x128xf32>
    %109 = vector.broadcast %58 : vector<8x1xf32> to vector<8x128xf32>
    %110 = vector.broadcast %70 : vector<1x128xf32> to vector<8x128xf32>
    %111 = arith.maximumf %109, %110 : vector<8x128xf32>
    %112 = vector.broadcast %52 : vector<8x1xf32> to vector<8x128xf32>
    %113 = vector.broadcast %64 : vector<1x128xf32> to vector<8x128xf32>
    %114 = arith.minimumf %112, %113 : vector<8x128xf32>
    %115 = arith.subf %111, %114 : vector<8x128xf32>
    %116 = arith.mulf %108, %115 : vector<8x128xf32>
    %cst_24 = arith.constant 9.99999971E-10 : f32
    %117 = vector.broadcast %cst_24 : f32 to vector<8x128xf32>
    %118 = arith.maximumf %116, %117 : vector<8x128xf32>
    %119 = tpu.reciprocal %101 {approx = true} : vector<8x128xf32> -> vector<8x128xf32>
    %120 = arith.mulf %95, %119 : vector<8x128xf32>
    %cst_25 = arith.constant 1.000000e+00 : f32
    %121 = vector.broadcast %cst_25 : f32 to vector<8x128xf32>
    %122 = arith.subf %121, %120 : vector<8x128xf32>
    %123 = tpu.reciprocal %118 {approx = true} : vector<8x128xf32> -> vector<8x128xf32>
    %124 = arith.mulf %101, %123 : vector<8x128xf32>
    %125 = arith.subf %122, %124 : vector<8x128xf32>
    %126 = arith.addf %46, %125 : vector<8x128xf32>
    %c0_26 = arith.constant 0 : index
    %c0_27 = arith.constant 0 : index
    %c0_28 = arith.constant 0 : index
    %127 = vector.load %arg6[%c0_26, %c0_27, %c0_28] : memref<1x8x128xf32, #tpu.memory_space<vmem>>, vector<1x8x128xf32>
    %128 = vector.shape_cast %127 : vector<1x8x128xf32> to vector<8x128xf32>
    %129 = vector.shape_cast %126 : vector<8x128xf32> to vector<1x8x128xf32>
    tpu.vector_store %arg6[%c0_26, %c0_27, %c0_28], %129 {strides = array<i32>} : memref<1x8x128xf32, #tpu.memory_space<vmem>>, vector<1x8x128xf32>,
    return
  }
  func.func @transform_0(%arg0: i32, %arg1: i32) -> (i32, i32, i32) {
    %c0_i32 = arith.constant 0 : i32
    %c0_i32_0 = arith.constant 0 : i32
    return %arg0, %arg1, %c0_i32 : i32, i32, i32
  }
  func.func @transform_1(%arg0: i32, %arg1: i32) -> (i32, i32, i32) {
    %c0_i32 = arith.constant 0 : i32
    %c0_i32_0 = arith.constant 0 : i32
    return %arg0, %arg1, %c0_i32 : i32, i32, i32
  }
  func.func @transform_2(%arg0: i32, %arg1: i32) -> (i32, i32, i32) {
    %c0_i32 = arith.constant 0 : i32
    %c0_i32_0 = arith.constant 0 : i32
    %c0_i32_1 = arith.constant 0 : i32
    return %arg0, %c0_i32, %c0_i32_0 : i32, i32, i32
  }
  func.func @transform_3(%arg0: i32, %arg1: i32) -> (i32, i32, i32) {
    %c0_i32 = arith.constant 0 : i32
    %c0_i32_0 = arith.constant 0 : i32
    %c0_i32_1 = arith.constant 0 : i32
    return %arg0, %c0_i32, %c0_i32_0 : i32, i32, i32
  }
  func.func @transform_4(%arg0: i32, %arg1: i32) -> (i32, i32, i32) {
    %c0_i32 = arith.constant 0 : i32
    %c0_i32_0 = arith.constant 0 : i32
    return %arg0, %arg1, %c0_i32 : i32, i32, i32
  }
}

</mosaic_0001>

<bundles_post_ra>
// kernel: tpu_custom_call.1
= control target key start
LH: loop header
LB: loop body
LE: loop exit
PB: predicated region body
PF: predicated region fallthrough
CT: control target
= control target key end

     0   :  { %9 = vsyncpa [#allocation3], 0  ;;  %s1172_s0 = inlined_call_operand.vmem [shape: f32[2,8,128], index: 0, kind: input, shape index: {}]   ;;  %s1173_s1 = inlined_call_operand.vmem [shape: f32[2,8,4], index: 1, kind: input, shape index: {}]   ;;  %s1174_s2 = inlined_call_operand.hbm [shape: f32[2,128,128], index: 2, kind: input, shape index: {}]   ;;  %s1175_s3 = inlined_call_operand.vmem [shape: f32[2,4,128], index: 3, kind: input, shape index: {}]   ;;  %s1176_s4 = inlined_call_operand.hbm [shape: f32[2,8,128], index: 4, kind: output, shape index: {}]  }
   0x1   :  { %11 = vsyncpa [#allocation3 + $0x1], 0 }
   0x2   :  { %12 = vsyncpa [#allocation4], 0 }
   0x3   :  { %14 = vsyncpa [#allocation4 + $0x1], 0  ;;  %s980_s15 = smov 0   ;;  %s982_s16 = smov 0  }
   0x4   :  { %s984_s17 = smov 0   ;;  %s986_s18 = smov 0  }
   0x5   :  { %s988_s19 = smov 0   ;;  %s990_s20 = smov 0  }
   0x6 LB: > { %s676_s21 = sadd.s32 4294967295, %s941_s20   ;;  %s677_s22 = sadd.s32 4294967294, %s941_s20   ;;  %s941_s20 = sphi %s990_s20, %s20_s20   ;;  %s937_s19 = sphi %s988_s19, %s1187_s19   ;;  %s933_s18 = sphi %s986_s18, %s1186_s18   ;;  %s929_s17 = sphi %s984_s17, %s1185_s17   ;;  %s925_s16 = sphi %s982_s16, %s1184_s16   ;;  %s921_s15 = sphi %s980_s15, %s1183_s15  }
   0x7   : > { %s32_s23 = sadd.s32 1, %s937_s19  ;;  %s95_s24 = sadd.s32 1, %s929_s17 }
   0x8   : > { %p34_p0 = scmp.ge.s32.totalorder %s32_s23, 2  ;;  %p102_p1 = scmp.ne.s32.totalorder %s929_s17, %s925_s16 }
   0x9   : > { %p103_p2 = scmp.eq.s32.totalorder %s941_s20, 0  ;;  %p108_p3 = scmp.ne.s32.totalorder %s925_s16, %s921_s15 }
   0xa   : > { %s1189_s23 = smov (%p34_p0, %s32_s23), 0  ;;  %p109_p5 = scmp.eq.s32.totalorder %s676_s21, 0 }
   0xb   : > { %p1021_p4 = por %p103_p2, %p102_p1  ;;  %s92_s26 = ssub.s32 %s937_s19, %s1189_s23 }
   0xc   : > { %p160_p6 = scmp.eq.s32.totalorder %s676_s21, 1  ;;  %p93_p7 = scmp.eq.s32.totalorder %s92_s26, 0 }
   0xd   : > { %p1027_p8 = por %p109_p5, %p108_p3  ;;  %p166_p10 = scmp.eq.s32.totalorder %s677_s22, 1 }
   0xe   : > { %p1031_p9 = por %p160_p6, %p102_p1  ;;  %p758_p13 = scmp.lt.s32.totalorder %s941_s20, 2 }
   0xf   : > { %s1036_s29 = scalar_select %p93_p7, %s929_s17, %s95_s24  }
  0x10   : > { %p1038_p11 = por %p166_p10, %p108_p3  ;;  %s206_s5 = sand.u32 1, %s929_s17  }
  0x11   : > { %s680_s6 = sshll.u32 %s206_s5, 7  ;;  %s693_s7 = sshll.u32 %s937_s19, 11 }
  0x12   : > { %s216_s10 = scalar_lea.hbm %s1174_s2, %s693_s7  ;;  %s210_s11 = scalar_lea.vmem [#allocation2], %s680_s6 }
  0x13   : > { %s217_s12 = sshll.u32 %s210_s11, 4  ;;  %p1051_p0 = pnand %p758_p13, %p1021_p4  ;;  %s218_s12 = int_to_ptr.vmem [resolvable:$true] %s217_s12 }
  0x14   : > { %p683_p1 = scmp.ge.s32.totalorder %s941_s20, 1  ;;  %s207_s14 = scalar_lea.sflag [#allocation3], %s206_s5 }
  0x15   : > { %p835_p2 = pneg %p1051_p0  ;;  %s846_s21 = scalar_lea.vmem %s218_s12, 2048 }
  0x16   : > { %p847_p3 = scmp.ne.s32.totalorder %s218_s12, %s846_s21  ;;  %s943_s22 = smov [#allocation2]  }
  0x17   : > { %s851_s24 = sshll.u32 %s943_s22, 4  ;;  %s852_s24 = int_to_ptr.vmem [resolvable:$false] %s851_s24 }
  0x18   : > { %p849_p5 = pnand %p847_p3, %p835_p2  ;;  %s853_s26 = scalar_lea.vmem %s852_s24, 4096 }
  0x19   : > { %p854_p7 = scmp.lt.s32.totalorder %s218_s12, %s852_s24  ;;  %p855_p10 = scmp.lt.s32.totalorder %s853_s26, %s846_s21 }
  0x1a   : > { %p850_p6 = pneg %p849_p5 }
  0x1b   : > { %p856_p12 = por %p855_p10, %p854_p7 }
  0x1d   : > { %p857_p4 = pnand %p856_p12, %p850_p6 }
  0x1f   : > { %860 = shalt.err (!%p857_p4)
}
  0x20   : > { %s944_s25 = smov 128   ;;  %s945_s5 = smov 8  }
  0x21   : > { %753 = dma.hbm_to_vmem [thread:$0]  (!%p1051_p0), %s216_s10, 2048, %s218_s12, %s207_s14, %s944_s25, %s944_s25, %s945_s5  }
  0x22   : > { %p232_p13 = scmp.lt.s32.totalorder %s941_s20, 3 }
  0x24   : > { %p233_p2 = pnand %p683_p1, %p232_p13 }
  0x25   : > { %s1064_s6 = sand.u32 (!%p233_p2), 1, %s925_s16  }
  0x26   : > { %236 = sbr.rel (%p233_p2) target bundleno = 571 (0x23b), region = 36  ;;  %s684_s7 = sshll.u32 (!%p233_p2), %s1064_s6, 7 }
  0x27   : > { %s239_s8 = scalar_lea.sflag (!%p233_p2), [#allocation3], %s1064_s6  ;;  %s1068_s9 = scalar_lea.vmem (!%p233_p2), [#allocation2], %s684_s7 }
  0x2b   : > { %912 = dma.done.wait (%p1027_p8), %s239_s8, 2048  }
  0x2c   : > { %914 = vsyncadd (%p1027_p8), %s239_s8, 4294965248  ;;  %p285_p12 = scmp.lt.s32.totalorder %s933_s18, 1  ;;  %s946_s27 = smov 126   ;;  %v947_v3 = vmov 0   ;;  %v328_v4 = vld [vmem:[%s1068_s9 + $0x78] sm:$0xff]  ;;  %v948_v5 = vmov 0.0   ;;  %v336_v39 = vlaneseq }
  0x2d   : > { %819 = vset.pattern.permute.xlu1 %v947_v3  ;;  %818 = vset.pattern.permute.xlu0 %v947_v3  ;;  %v327_v6 = vld [vmem:[%s1068_s9 + $0x70] sm:$0xff]  ;;  %v326_v7 = vld [vmem:[%s1068_s9 + $0x68] sm:$0xff]  ;;  %v325_v8 = vld [vmem:[%s1068_s9 + $0x60] sm:$0xff]  ;;  %s949_s26 = smov 127   ;;  %v950_v17 = vmov 1   ;;  %vm951_vm0 = vmmov 0  }
  0x2e   : > { %s1076_s10 = scalar_select %p285_p12, %s933_s18, 1  ;;  %711 = vmatprep.subr.mxu0 %v948_v5  ;;  %v324_v12 = vld [vmem:[%s1068_s9 + $0x58] sm:$0xff]  ;;  %v323_v14 = vld [vmem:[%s1068_s9 + $0x50] sm:$0xff]  ;;  %v322_v15 = vld [vmem:[%s1068_s9 + $0x48] sm:$0xff]  ;;  %743 = vmatprep.mubr.msk.f32.mxu0 %vm951_vm0, %v948_v5  ;;  %v952_v32 = vmov 2   ;;  %v953_v33 = vmov 3  }
  0x2f   : > { %712 = vmatpush3.msra.mxu0 %v328_v4  ;;  %v321_v16 = vld [vmem:[%s1068_s9 + $0x40] sm:$0xff]  ;;  %v320_v22 = vld [vmem:[%s1068_s9 + $0x38] sm:$0xff]  ;;  %v319_v23 = vld [vmem:[%s1068_s9 + $0x30] sm:$0xff]  ;;  %v337_v42 = vshrl.u32 %v336_v39, 7  ;;  %s541_s22 = scalar_lea.sflag [#allocation4], %s1064_s6 }
  0x30   : > { %s686_s11 = sshll.u32 %s1076_s10, 3  ;;  %713 = vmatprep.subr.mxu0 %v948_v5  ;;  %v318_v24 = vld [vmem:[%s1068_s9 + $0x28] sm:$0xff]  ;;  %v317_v25 = vld [vmem:[%s1068_s9 + $0x20] sm:$0xff]  ;;  %v316_v26 = vld [vmem:[%s1068_s9 + $0x18] sm:$0xff]  ;;  %s688_s25 = sshll.u32 %s1076_s10, 2 }
  0x31   : > { %s291_s14 = scalar_lea.vmem %s1172_s0, %s686_s11  ;;  %s298_s24 = scalar_lea.vmem %s1173_s1, %s686_s11  ;;  %714 = vmatpush3.msra.mxu0 %v327_v6  ;;  %v315_v27 = vld [vmem:[%s1068_s9 + $0x10] sm:$0xff]  ;;  %v314_v28 = vld [vmem:[%s1068_s9 + $0x8] sm:$0xff]  ;;  %v313_v29 = vld [vmem:[%s1068_s9] sm:$0xff]  ;;  %v338_v46 = vsub.s32 0, %v337_v42  ;;  %v348_v47 = vsub.s32 1, %v337_v42 }
  0x32   : > { %v303_v0 = vld [vmem:[%s291_s14] sm:$0xff]  ;;  %715 = vmatprep.subr.mxu0 %v948_v5  ;;  %s302_s8 = scalar_lea.vmem %s1175_s3, %s688_s25  ;;  %s685_s9 = sshll.u32 %s1064_s6, 3 }
  0x33   : > { %v1085_v1 = vld [vmem:[%s298_s24] sm:$0xff]  ;;  %304 = vmax.xlane.f32.xlu0 %v303_v0  ;;  %716 = vmatpush3.msra.mxu0 %v326_v7  ;;  %s690_s10 = sshll.u32 %s933_s18, 7  ;;  %s284_s11 = scalar_lea.vmem [#allocation5], %s685_s9 }
  0x34   : > { %v445_v2 = vmul.f32 0.5, %v1085_v1  ;;  %717 = vmatprep.subr.mxu0 %v948_v5  ;;  %v330_v37 = vld [vmem:[%s302_s8] sm:$0xf]  ;;  %s555_s12 = sshll.u32 %s284_s11, 4  ;;  %s553_s21 = scalar_lea.hbm %s1176_s4, %s690_s10  ;;  %s556_s12 = int_to_ptr.vmem [resolvable:$true] %s555_s12 }
  0x35   : > { %718 = vmatpush3.msra.mxu0 %v325_v8  ;;  %v452_v38 = vmul.f32 0.5, %v330_v37  ;;  %s861_s24 = scalar_lea.vmem %s556_s12, 128 }
  0x36   : > { %447 = vrot.lane.b32.xlu1 %v445_v2, %s946_s27  ;;  %719 = vmatprep.subr.mxu0 %v948_v5  ;;  %p862_p8 = scmp.ne.s32.totalorder %s556_s12, %s861_s24  ;;  %s954_s27 = smov [#allocation5]  }
  0x37   : > { %720 = vmatpush3.msra.mxu0 %v324_v12  ;;  %v454_v41 = vrot.slane %v452_v38, 2  ;;  %s865_s18 = sshll.u32 %s954_s27, 4  ;;  %s866_s18 = int_to_ptr.vmem [resolvable:$false] %s865_s18 }
  0x38   : > { %721 = vmatprep.subr.mxu0 %v948_v5  ;;  %p863_p0 = pnand %p862_p8, %p1031_p9  ;;  %p868_p3 = scmp.lt.s32.totalorder %s556_s12, %s866_s18 }
  0x39   : > { %722 = vmatpush3.msra.mxu0 %v323_v14  ;;  %v456_v43 = vsub.f32 %v330_v37, %v454_v41  ;;  %v457_v44 = vadd.f32 %v454_v41, %v330_v37 }
  0x3a   : > { %723 = vmatprep.subr.mxu0 %v948_v5  ;;  %p864_p1 = pneg %p863_p0 }
  0x3b   : > { %724 = vmatpush3.msra.mxu0 %v322_v15  ;;  %v464_v48 = vsub.f32 %v457_v44, %v456_v43  ;;  %v487_v49 = vrot.slane %v456_v43, %v338_v46  ;;  %v498_v50 = vrot.slane %v457_v44, %v348_v47  ;;  %v507_v51 = vrot.slane %v456_v43, %v348_v47 }
  0x3c   : > { %725 = vmatprep.subr.mxu0 %v948_v5  ;;  %v477_v52 = vrot.slane %v457_v44, %v338_v46 }
  0x3d   : > { %726 = vmatpush3.msra.mxu0 %v321_v16  ;;  %v466_v55 = vrot.slane %v464_v48, 1 }
  0x3e   : > { %727 = vmatprep.subr.mxu0 %v948_v5 }
  0x3f   : > { %728 = vmatpush3.msra.mxu0 %v320_v22  ;;  %v468_v62 = vmul.f32 %v466_v55, %v464_v48 }
  0x40   : > { %729 = vmatprep.subr.mxu0 %v948_v5 }
  0x41   : > { %730 = vmatpush3.msra.mxu0 %v319_v23 }
  0x42   : > { %731 = vmatprep.subr.mxu0 %v948_v5 }
  0x43   : > { %732 = vmatpush3.msra.mxu0 %v318_v24 }
  0x44   : > { %733 = vmatprep.subr.mxu0 %v948_v5 }
  0x45   : > { %734 = vmatpush3.msra.mxu0 %v317_v25 }
  0x46   : > { %735 = vmatprep.subr.mxu0 %v948_v5 }
  0x47   : > { %736 = vmatpush3.msra.mxu0 %v316_v26 }
  0x48   : > { %737 = vmatprep.subr.mxu0 %v948_v5 }
  0x49   : > { %738 = vmatpush3.msra.mxu0 %v315_v27 }
  0x4a   : > { %739 = vmatprep.subr.mxu0 %v948_v5 }
  0x4b   : > { %740 = vmatpush3.msra.mxu0 %v314_v28 }
  0x4c   : > { %741 = vmatprep.subr.mxu0 %v948_v5 }
  0x4d   : > { %742 = vmatpush3.msra.mxu0 %v313_v29 }
  0xa8   : > { %v448_v9 = vpop.permute.xlu1 %447 }
  0xa9   : > { %v450_v10 = vsub.f32 %v1085_v1, %v448_v9  ;;  %v451_v11 = vadd.f32 %v448_v9, %v1085_v1 }
  0xab   : > { %v458_v13 = vsub.f32 %v451_v11, %v450_v10 }
  0xad   : > { %460 = vrot.lane.b32.xlu1 %v458_v13, %s949_s26  ;;  %s867_s26 = scalar_lea.vmem %s866_s18, 256 }
  0xae   : > { %p869_p5 = scmp.lt.s32.totalorder %s867_s26, %s861_s24 }
  0xb0   : > { %p870_p6 = por %p869_p5, %p868_p3 }
  0xb1   : > { %481 = vperm.xlu1 %819, %v450_v10  }
  0xb2   : > { %p871_p7 = pnand %p870_p6, %p864_p1 }
  0xb5   : > { %820 = vset.pattern.permute.xlu1 %v950_v17 }
  0xb6   : > { %492 = vperm.xlu1 %820, %v451_v11  }
  0xba   : > { %501 = vperm.xlu1 %820, %v450_v10  }
  0xbc   : > { %v305_v18 = vpop.xlane.xlu0 %304 }
  0xbd   : > { %v306_v19 = vsub.f32 %v303_v0, %v305_v18  ;;  %v349_v18 = vrot.slane %v330_v37, %v348_v47 }
  0xbe   : > { %821 = vset.pattern.permute.xlu1 %v947_v3 }
  0xbf   : > { %v307_v20 = vmul.f32 1.442695, %v306_v19  ;;  %v359_v19 = vsub.s32 2, %v337_v42 }
  0xc1   : > { %825 = vpow2.f32 %v307_v20  ;;  %v360_v24 = vrot.slane %v330_v37, %v359_v19 }
  0xce   : > { %v826_v21 = vpop.eup %825 }
  0xcf   : > { %309 = vadd.xlane.f32.xlu0 %v826_v21 }
  0xe5   : > { %471 = vperm.xlu0 %818, %v451_v11  }
 0x11f   : > { %v461_v30 = vpop.permute.xlu1 %460 }
 0x120   : > { %v463_v31 = vmul.f32 %v461_v30, %v458_v13 }
 0x122   : > { %514 = vperm.xlu1 %821, %v463_v31  }
 0x126   : > { %333 = vperm.xlu1 %821, %v1085_v1  }
 0x12a   : > { %822 = vset.pattern.permute.xlu1 %v950_v17  ;;  %v339_v17 = vrot.slane %v330_v37, %v338_v46 }
 0x12b   : > { %343 = vperm.xlu1 %822, %v1085_v1  }
 0x12c   : > { %v482_v40 = vpop.permute.xlu1 %481 }
 0x12d   : > { %v488_v56 = vmax.f32 %v482_v40, %v487_v49  ;;  %v525_v5 = vmin.f32 %v482_v40, %v487_v49 }
 0x12f   : > { %823 = vset.pattern.permute.xlu1 %v952_v32 }
 0x130   : > { %354 = vperm.xlu1 %823, %v1085_v1  }
 0x131   : > { %v493_v45 = vpop.permute.xlu1 %492 }
 0x132   : > { %v499_v57 = vmin.f32 %v493_v45, %v498_v50  ;;  %v527_v6 = vmax.f32 %v493_v45, %v498_v50 }
 0x134   : > { %824 = vset.pattern.permute.xlu1 %v953_v33 }
 0x135   : > { %365 = vperm.xlu1 %824, %v1085_v1   ;;  %v502_v53 = vpop.permute.xlu1 %501  ;;  %v520_v1 = vrot.slane %v468_v62, %v338_v46 }
 0x136   : > { %v508_v58 = vmax.f32 %v502_v53, %v507_v51  ;;  %v528_v7 = vmin.f32 %v502_v53, %v507_v51 }
 0x138   : > { %v509_v60 = vsub.f32 %v499_v57, %v508_v58  ;;  %v529_v11 = vsub.f32 %v527_v6, %v528_v7 }
 0x13a   : > { %v510_v63 = vmax.f32 %v509_v60, 0.0 }
 0x158   : > { %v310_v34 = vpop.xlane.xlu0 %309 }
 0x159   : > { %827 = vrcp.f32 %v310_v34 }
 0x160   : > { %v472_v54 = vpop.permute.xlu0 %471 }
 0x161   : > { %v478_v59 = vmin.f32 %v472_v54, %v477_v52  ;;  %v524_v8 = vmax.f32 %v472_v54, %v477_v52 }
 0x163   : > { %v489_v61 = vsub.f32 %v478_v59, %v488_v56  ;;  %v526_v12 = vsub.f32 %v524_v8, %v525_v5 }
 0x165   : > { %v490_v0 = vmax.f32 %v489_v61, 0.0  ;;  %v530_v14 = vmul.f32 %v529_v11, %v526_v12 }
 0x166   : > { %v828_v35 = vpop.eup %827 }
 0x167   : > { %v312_v36 = vmul.f32 %v828_v35, %v826_v21  ;;  %v511_v3 = vmul.f32 %v510_v63, %v490_v0  ;;  %v531_v16 = vmax.f32 %v530_v14, 1e-09  ;;  %v370_v21 = vsub.s32 3, %v337_v42 }
 0x169   : > { %744 = vmatmul.mubr.f32.vlgmr.msra.gmra.mxu0 %v312_v36  ;;  %v371_v28 = vrot.slane %v330_v37, %v370_v21 }
 0x19d   : > { %v515_v2 = vpop.permute.xlu1 %514 }
 0x19e   : > { %v521_v4 = vadd.f32 %v520_v1, %v515_v2 }
 0x1a0   : > { %v522_v9 = vsub.f32 %v521_v4, %v511_v3 }
 0x1a1   : > { %v334_v10 = vpop.permute.xlu1 %333 }
 0x1a2   : > { %v523_v13 = vmax.f32 %v522_v9, 1e-09  ;;  %v340_v22 = vsub.f32 %v334_v10, %v339_v17 }
 0x1a4   : > { %829 = vrcp.f32 %v523_v13  ;;  %v341_v25 = vand.u32 2147483647, %v340_v22 }
 0x1a5   : > { %831 = vrcp.f32 %v531_v16 }
 0x1a6   : > { %v344_v15 = vpop.permute.xlu1 %343 }
 0x1a7   : > { %v350_v23 = vsub.f32 %v344_v15, %v349_v18 }
 0x1a9   : > { %v351_v26 = vand.u32 2147483647, %v350_v23 }
 0x1ab   : > { %v355_v20 = vpop.permute.xlu1 %354  ;;  %v352_v31 = vadd.f32 %v351_v26, %v341_v25 }
 0x1ac   : > { %v361_v27 = vsub.f32 %v355_v20, %v360_v24 }
 0x1ae   : > { %v362_v32 = vand.u32 2147483647, %v361_v27 }
 0x1b0   : > { %v366_v29 = vpop.permute.xlu1 %365  ;;  %v363_v35 = vadd.f32 %v362_v32, %v352_v31 }
 0x1b1   : > { %v830_v30 = vpop.eup %829  ;;  %v372_v33 = vsub.f32 %v366_v29, %v371_v28 }
 0x1b2   : > { %v533_v34 = vmul.f32 %v830_v30, %v511_v3  ;;  %v832_v38 = vpop.eup %831 }
 0x1b3   : > { %v373_v36 = vand.u32 2147483647, %v372_v33  ;;  %v536_v40 = vmul.f32 %v832_v38, %v523_v13 }
 0x1b4   : > { %v534_v39 = vsub.f32 1.0, %v533_v34 }
 0x1b5   : > { %v374_v41 = vadd.f32 %v373_v36, %v363_v35 }
 0x1b6   : > { %v537_v43 = vsub.f32 %v534_v39, %v536_v40 }
 0x229   : > { %v441_v42 = vpop.f32.mrf.mxu0 }
 0x22a   : > { %v442_v37 = vadd.f32 %v441_v42, %v374_v41 }
 0x22b   : > { %v745_v44 = vpop.f32.mrf.mxu0 }
 0x22c   : > { %v538_v45 = vadd.f32 %v537_v43, %v442_v37 }
 0x22e   : > { %539 = vst [vmem:[%s284_s11] sm:$0xff] %v538_v45 }
 0x22f   : > { %874 = shalt.err (!%p871_p7)
}
 0x230   : > { %s875_s25 = scalar_lea.hbm %s553_s21, 128  ;;  %s879_s7 = scalar_lea.hbm %s1176_s4, 256 }
 0x231   : > { %p876_p10 = scmp.ne.s32.totalorder %s553_s21, %s875_s25  ;;  %p880_p2 = scmp.lt.s32.totalorder %s553_s21, %s1176_s4 }
 0x232   : > { %p881_p12 = scmp.lt.s32.totalorder %s879_s7, %s875_s25 }
 0x233   : > { %p877_p4 = pnand %p876_p10, %p1031_p9 }
 0x234   : > { %p882_p8 = por %p881_p12, %p880_p2 }
 0x235   : > { %p878_p13 = pneg %p877_p4 }
 0x237   : > { %p883_p0 = pnand %p882_p8, %p878_p13 }
 0x239   : > { %886 = shalt.err (!%p883_p0)
}
 0x23a   : > { %748 = dma.vmem_to_hbm [thread:$0]  (%p1031_p9), %s556_s12, 128, %s553_s21, %s541_s22  }
 0x23b PF: > { %s567_s10 = sand.u32 1, %s921_s15   ;;  %p1182_p1 = scmp.ge.s32.totalorder %s941_s20, 2 }
 0x23c   : > { %s568_s11 = scalar_lea.sflag [#allocation4], %s567_s10 }
 0x23d   : > { %p755_p3 = pnand %p1182_p1, %p1038_p11 }
 0x23f   : > { %p756_p5 = pneg %p755_p3 }
 0x241   : > { %916 = dma.done.wait (%p756_p5), %s568_s11, 128  }
 0x242   : > { %918 = vsyncadd (%p756_p5), %s568_s11, 4294967168  ;;  %s20_s20 = sadd.s32 1, %s941_s20   ;;  %s1183_s15 = smov %s925_s16 }
 0x243   : > { %p17_p6 = scmp.ge.s32.totalorder %s20_s20, 4   ;;  %s1184_s16 = smov %s929_s17 }
 0x244   : > { %s1185_s17 = smov %s1036_s29  ;;  %s1186_s18 = smov %s937_s19 }
 0x245   : > { %s1187_s19 = smov %s1189_s23  ;;  %19 = sbr.rel (!%p17_p6) target bundleno = 6 (0x6), region = 90 }
 0x24a   :  { %573 = vsyncpa [#allocation3], 1 }
 0x24b   :  { %575 = vsyncpa [#allocation3 + $0x1], 1 }
 0x24c   :  { %576 = vsyncpa [#allocation4], 1 }
 0x24d   :  { %578 = vsyncpa [#allocation4 + $0x1], 1 }

</bundles_post_ra>
